<compile_context>
chip_gen: v7x
topology: tpu7x:2x2x1
jax: 0.10.0
libtpu: 0.0.40
codegen_flags: <defaults>
</compile_context>

<pallas_src>
import jax
import jax.numpy as jnp
from jax.experimental import pallas as pl
from jax.experimental.pallas import tpu as pltpu

NZ = 2
IMAGE_SIZE = 28
H1 = NZ * 4            # 8
H2 = NZ * 16           # 32
OUT = IMAGE_SIZE ** 2  # 784
BN_EPS = 1e-5
LRELU_SLOPE = 0.2


def _leaky_relu(x):
    return jnp.where(x > 0, x, LRELU_SLOPE * x)


def _batchnorm_train(x, gamma, beta):
    # nn.BatchNorm1d in training mode (fresh nn.Module defaults): batch stats,
    # biased variance, affine scale/shift.  (Used by the pure-JAX reference.)
    mean = jnp.mean(x, axis=0, keepdims=True)
    var = jnp.mean((x - mean) ** 2, axis=0, keepdims=True)
    return (x - mean) * jax.lax.rsqrt(var + BN_EPS) * gamma + beta


# ----------------------------------------------------------------------------
# Fused kernel factory (closes over static batch / padding / tile sizes).
# ----------------------------------------------------------------------------
def _make_generator_kernel(batch, batch_pad, tile_rows):
    inv_n = 1.0 / float(batch)

    def _bn_train(h, gamma, beta):
        if batch_pad == batch:
            mean = jnp.mean(h, axis=0, keepdims=True)
            d = h - mean
            var = jnp.mean(d * d, axis=0, keepdims=True)
        else:
            # Mask out zero-padded rows so BN statistics match the un-padded
            # PyTorch batch exactly.
            row = jax.lax.broadcasted_iota(jnp.int32, (batch_pad, 1), 0)
            mask = (row < batch).astype(jnp.float32)
            mean = jnp.sum(h * mask, axis=0, keepdims=True) * inv_n
            d = (h - mean) * mask
            var = jnp.sum(d * d, axis=0, keepdims=True) * inv_n
        return (h - mean) * jax.lax.rsqrt(var + BN_EPS) * gamma + beta

    def kernel(z_ref,
               w1_ref, b1_ref,
               w2_ref, g2_ref, be2_ref,
               w3_ref, g3_ref, be3_ref,
               w4_ref, b4_ref,
               out_ref, h_scratch):
        i = pl.program_id(0)

        # Full-batch feature stack, computed once and cached in VMEM scratch.
        @pl.when(i == 0)
        def _():
            x = z_ref[...]

            # Linear(nz, nz*4) + LeakyReLU(0.2)
            h = jnp.dot(x, w1_ref[...],
                        preferred_element_type=jnp.float32) + b1_ref[...]
            h = _leaky_relu(h)

            # Linear(nz*4, nz*16) + BatchNorm1d + LeakyReLU(0.2)
            # (Linear bias omitted: cancelled exactly by BN mean subtraction.)
            h = jnp.dot(h, w2_ref[...], preferred_element_type=jnp.float32)
            h = _leaky_relu(_bn_train(h, g2_ref[...], be2_ref[...]))

            # Linear(nz*16, nz*16) + BatchNorm1d + LeakyReLU(0.2)
            h = jnp.dot(h, w3_ref[...], preferred_element_type=jnp.float32)
            h = _leaky_relu(_bn_train(h, g3_ref[...], be3_ref[...]))

            h_scratch[...] = h

        # Pipelined, HBM-write-bound head: Linear(nz*16, 784) + Tanh.
        row0 = pl.multiple_of(i * tile_rows, tile_rows)
        h_tile = h_scratch[pl.ds(row0, tile_rows), :]
        y = jnp.dot(h_tile, w4_ref[...],
                    preferred_element_type=jnp.float32) + b4_ref[...]
        out_ref[...] = jnp.tanh(y).astype(out_ref.dtype)

    return kernel


def init_params(key):
    ks = jax.random.split(key, 8)

    def linear(kw, kb, fan_in, fan_out):
        # Deterministic, PyTorch-like uniform(-1/sqrt(fan_in), 1/sqrt(fan_in)).
        bound = 1.0 / jnp.sqrt(jnp.float32(fan_in))
        w = jax.random.uniform(kw, (fan_in, fan_out), jnp.float32, -bound, bound)
        b = jax.random.uniform(kb, (1, fan_out), jnp.float32, -bound, bound)
        return w, b

    w1, b1 = linear(ks[0], ks[1], NZ, H1)
    w2, b2 = linear(ks[2], ks[3], H1, H2)
    w3, b3 = linear(ks[4], ks[5], H2, H2)
    w4, b4 = linear(ks[6], ks[7], H2, OUT)

    # BatchNorm affine params: fresh-module init (weight=1, bias=0).
    g2 = jnp.ones((1, H2), jnp.float32)
    be2 = jnp.zeros((1, H2), jnp.float32)
    g3 = jnp.ones((1, H2), jnp.float32)
    be3 = jnp.zeros((1, H2), jnp.float32)

    return dict(w1=w1, b1=b1, w2=w2, b2=b2, g2=g2, be2=be2,
                w3=w3, b3=b3, g3=g3, be3=be3, w4=w4, b4=b4)


def _round_up(x, m):
    return ((x + m - 1) // m) * m


def generator_forward(z, params, *, tile_rows=512, out_dtype=jnp.float32):
    z2d = z.reshape(-1, NZ).astype(jnp.float32)
    B = z2d.shape[0]

    tb = min(tile_rows, _round_up(B, 8))     # sublane-aligned batch tile
    b_pad = _round_up(B, tb)
    if b_pad != B:
        z2d = jnp.pad(z2d, ((0, b_pad - B), (0, 0)))
    grid = (b_pad // tb,)

    kernel = _make_generator_kernel(B, b_pad, tb)

    out = pl.pallas_call(
        kernel,
        out_shape=jax.ShapeDtypeStruct((b_pad, OUT), out_dtype),
        grid=grid,
        in_specs=[
            pl.BlockSpec((b_pad, NZ), lambda i: (0, 0)),   # z, resident
            pl.BlockSpec((NZ, H1), lambda i: (0, 0)),      # w1
            pl.BlockSpec((1, H1), lambda i: (0, 0)),       # b1
            pl.BlockSpec((H1, H2), lambda i: (0, 0)),      # w2
            pl.BlockSpec((1, H2), lambda i: (0, 0)),       # gamma2
            pl.BlockSpec((1, H2), lambda i: (0, 0)),       # beta2
            pl.BlockSpec((H2, H2), lambda i: (0, 0)),      # w3
            pl.BlockSpec((1, H2), lambda i: (0, 0)),       # gamma3
            pl.BlockSpec((1, H2), lambda i: (0, 0)),       # beta3
            pl.BlockSpec((H2, OUT), lambda i: (0, 0)),     # w4, resident
            pl.BlockSpec((1, OUT), lambda i: (0, 0)),      # b4, resident
        ],
        out_specs=pl.BlockSpec((tb, OUT), lambda i: (i, 0)),
        scratch_shapes=[pltpu.VMEM((b_pad, H2), jnp.float32)],
        compiler_params=pltpu.CompilerParams(
            dimension_semantics=("arbitrary",)),
    )(z2d,
      params["w1"], params["b1"],
      params["w2"], params["g2"], params["be2"],
      params["w3"], params["g3"], params["be3"],
      params["w4"], params["b4"])

    if b_pad != B:
        out = out[:B]
    return out.reshape(-1, 1, IMAGE_SIZE, IMAGE_SIZE)


def _reference_forward(z, params):
    # Pure-JAX reference with the exact PyTorch module semantics
    # (including the b2/b3 biases, which BN cancels mathematically).
    x = z.reshape(-1, NZ).astype(jnp.float32)
    h = _leaky_relu(x @ params["w1"] + params["b1"])
    h = h @ params["w2"] + params["b2"]
    h = _leaky_relu(_batchnorm_train(h, params["g2"], params["be2"]))
    h = h @ params["w3"] + params["b3"]
    h = _leaky_relu(_batchnorm_train(h, params["g3"], params["be3"]))
    h = jnp.tanh(h @ params["w4"] + params["b4"])
    return h.reshape(-1, 1, IMAGE_SIZE, IMAGE_SIZE)


if __name__ == "__main__":
    key = jax.random.PRNGKey(0)
    k_params, k_input = jax.random.split(key)

    params = init_params(k_params)

    # batch=8 exercises the aligned path; batch=5 exercises the padded batch
    # (masked BatchNorm statistics) path.
    for batch in (8, 5):
        z = jax.random.normal(jax.random.fold_in(k_input, batch),
                              (batch, NZ), jnp.float32)
        out = jax.block_until_ready(generator_forward(z, params))
        ref = _reference_forward(z, params)
        assert out.shape == (batch, 1, IMAGE_SIZE, IMAGE_SIZE), out.shape
        assert jnp.allclose(out, ref, atol=1e-5, rtol=1e-5), (
            f"mismatch vs JAX reference at batch={batch}")

    print("KERNEL_OK")
</pallas_src>

<mosaic_0001>
module attributes {stable_mosaic.version = 11 : i64} {
  func.func @kernel(%arg0: i32, %arg1: memref<8x2xf32, #tpu.memory_space<vmem>>, %arg2: memref<2x8xf32, #tpu.memory_space<vmem>>, %arg3: memref<1x8xf32, #tpu.memory_space<vmem>>, %arg4: memref<8x32xf32, #tpu.memory_space<vmem>>, %arg5: memref<1x32xf32, #tpu.memory_space<vmem>>, %arg6: memref<1x32xf32, #tpu.memory_space<vmem>>, %arg7: memref<32x32xf32, #tpu.memory_space<vmem>>, %arg8: memref<1x32xf32, #tpu.memory_space<vmem>>, %arg9: memref<1x32xf32, #tpu.memory_space<vmem>>, %arg10: memref<32x784xf32, #tpu.memory_space<vmem>>, %arg11: memref<1x784xf32, #tpu.memory_space<vmem>>, %arg12: memref<8x784xf32, #tpu.memory_space<vmem>>, %arg13: memref<8x32xf32, #tpu.memory_space<vmem>>) attributes {dimension_semantics = [#tpu.dimension_semantics<arbitrary>], iteration_bounds = array<i64: 1>, scalar_prefetch = 0 : i64, scratch_operands = 1 : i64, tpu.core_type = #tpu.core_type<tc>, window_params = [{pipeline_mode = #tpu.pipeline_mode<synchronous>, transform_indices = @transform_0, window_bounds = array<i64: 8, 2>}, {pipeline_mode = #tpu.pipeline_mode<synchronous>, transform_indices = @transform_1, window_bounds = array<i64: 2, 8>}, {pipeline_mode = #tpu.pipeline_mode<synchronous>, transform_indices = @transform_2, window_bounds = array<i64: 1, 8>}, {pipeline_mode = #tpu.pipeline_mode<synchronous>, transform_indices = @transform_3, window_bounds = array<i64: 8, 32>}, {pipeline_mode = #tpu.pipeline_mode<synchronous>, transform_indices = @transform_4, window_bounds = array<i64: 1, 32>}, {pipeline_mode = #tpu.pipeline_mode<synchronous>, transform_indices = @transform_5, window_bounds = array<i64: 1, 32>}, {pipeline_mode = #tpu.pipeline_mode<synchronous>, transform_indices = @transform_6, window_bounds = array<i64: 32, 32>}, {pipeline_mode = #tpu.pipeline_mode<synchronous>, transform_indices = @transform_7, window_bounds = array<i64: 1, 32>}, {pipeline_mode = #tpu.pipeline_mode<synchronous>, transform_indices = @transform_8, window_bounds = array<i64: 1, 32>}, {pipeline_mode = #tpu.pipeline_mode<synchronous>, transform_indices = @transform_9, window_bounds = array<i64: 32, 784>}, {pipeline_mode = #tpu.pipeline_mode<synchronous>, transform_indices = @transform_10, window_bounds = array<i64: 1, 784>}, {transform_indices = @transform_11, window_bounds = array<i64: 8, 784>}]} {
    %c0_i32 = arith.constant 0 : i32
    %0 = arith.cmpi eq, %arg0, %c0_i32 : i32
    %1 = arith.extui %0 : i1 to i32
    %c0_i32_0 = arith.constant 0 : i32
    %2 = arith.cmpi ne, %1, %c0_i32_0 : i32
    scf.if %2 {
      %c0_7 = arith.constant 0 : index
      %c0_8 = arith.constant 0 : index
      %14 = vector.load %arg1[%c0_7, %c0_8] : memref<8x2xf32, #tpu.memory_space<vmem>>, vector<8x2xf32>
      %c0_9 = arith.constant 0 : index
      %c0_10 = arith.constant 0 : index
      %15 = vector.load %arg2[%c0_9, %c0_10] : memref<2x8xf32, #tpu.memory_space<vmem>>, vector<2x8xf32>
      %cst_11 = arith.constant dense<0.000000e+00> : vector<8x8xf32>
      %16 = tpu.matmul %14, %15, %cst_11 {dimension_numbers = #tpu.dot_dimension_numbers<[1], [0], [0], [1], [0, 0, 1, 1], [], []>} : vector<8x2xf32>, vector<2x8xf32>, vector<8x8xf32> -> vector<8x8xf32>
      %c0_12 = arith.constant 0 : index
      %c0_13 = arith.constant 0 : index
      %17 = vector.load %arg3[%c0_12, %c0_13] : memref<1x8xf32, #tpu.memory_space<vmem>>, vector<1x8xf32>
      %18 = vector.broadcast %17 : vector<1x8xf32> to vector<8x8xf32>
      %19 = arith.addf %16, %18 : vector<8x8xf32>
      %cst_14 = arith.constant 0.000000e+00 : f32
      %20 = vector.broadcast %cst_14 : f32 to vector<8x8xf32>
      %21 = arith.cmpf ogt, %19, %20 : vector<8x8xf32>
      %cst_15 = arith.constant 2.000000e-01 : f32
      %22 = vector.broadcast %cst_15 : f32 to vector<8x8xf32>
      %23 = arith.mulf %22, %19 : vector<8x8xf32>
      %24 = arith.select %21, %19, %23 : vector<8x8xi1>, vector<8x8xf32>
      %c0_16 = arith.constant 0 : index
      %c0_17 = arith.constant 0 : index
      %25 = vector.load %arg4[%c0_16, %c0_17] : memref<8x32xf32, #tpu.memory_space<vmem>>, vector<8x32xf32>
      %cst_18 = arith.constant dense<0.000000e+00> : vector<8x32xf32>
      %26 = tpu.matmul %24, %25, %cst_18 {dimension_numbers = #tpu.dot_dimension_numbers<[1], [0], [0], [1], [0, 0, 1, 1], [], []>} : vector<8x8xf32>, vector<8x32xf32>, vector<8x32xf32> -> vector<8x32xf32>
      %c0_19 = arith.constant 0 : index
      %c0_20 = arith.constant 0 : index
      %27 = vector.load %arg5[%c0_19, %c0_20] : memref<1x32xf32, #tpu.memory_space<vmem>>, vector<1x32xf32>
      %c0_21 = arith.constant 0 : index
      %c0_22 = arith.constant 0 : index
      %28 = vector.load %arg6[%c0_21, %c0_22] : memref<1x32xf32, #tpu.memory_space<vmem>>, vector<1x32xf32>
      %cst_23 = arith.constant dense<0.000000e+00> : vector<32xf32>
      %29 = vector.multi_reduction <add>, %26, %cst_23 [0] : vector<8x32xf32> to vector<32xf32>
      %30 = vector.shape_cast %29 : vector<32xf32> to vector<1x32xf32>
      %cst_24 = arith.constant 8.000000e+00 : f32
      %31 = vector.broadcast %cst_24 : f32 to vector<1x32xf32>
      %32 = arith.divf %30, %31 : vector<1x32xf32>
      %33 = vector.broadcast %32 : vector<1x32xf32> to vector<8x32xf32>
      %34 = arith.subf %26, %33 : vector<8x32xf32>
      %35 = arith.mulf %34, %34 : vector<8x32xf32>
      %cst_25 = arith.constant dense<0.000000e+00> : vector<32xf32>
      %36 = vector.multi_reduction <add>, %35, %cst_25 [0] : vector<8x32xf32> to vector<32xf32>
      %37 = vector.shape_cast %36 : vector<32xf32> to vector<1x32xf32>
      %cst_26 = arith.constant 8.000000e+00 : f32
      %38 = vector.broadcast %cst_26 : f32 to vector<1x32xf32>
      %39 = arith.divf %37, %38 : vector<1x32xf32>
      %40 = vector.broadcast %32 : vector<1x32xf32> to vector<8x32xf32>
      %41 = arith.subf %26, %40 : vector<8x32xf32>
      %cst_27 = arith.constant 9.99999974E-6 : f32
      %42 = vector.broadcast %cst_27 : f32 to vector<1x32xf32>
      %43 = arith.addf %39, %42 : vector<1x32xf32>
      %44 = math.rsqrt %43 : vector<1x32xf32>
      %45 = vector.broadcast %44 : vector<1x32xf32> to vector<8x32xf32>
      %46 = arith.mulf %41, %45 : vector<8x32xf32>
      %47 = vector.broadcast %27 : vector<1x32xf32> to vector<8x32xf32>
      %48 = arith.mulf %46, %47 : vector<8x32xf32>
      %49 = vector.broadcast %28 : vector<1x32xf32> to vector<8x32xf32>
      %50 = arith.addf %48, %49 : vector<8x32xf32>
      %cst_28 = arith.constant 0.000000e+00 : f32
      %51 = vector.broadcast %cst_28 : f32 to vector<8x32xf32>
      %52 = arith.cmpf ogt, %50, %51 : vector<8x32xf32>
      %cst_29 = arith.constant 2.000000e-01 : f32
      %53 = vector.broadcast %cst_29 : f32 to vector<8x32xf32>
      %54 = arith.mulf %53, %50 : vector<8x32xf32>
      %55 = arith.select %52, %50, %54 : vector<8x32xi1>, vector<8x32xf32>
      %c0_30 = arith.constant 0 : index
      %c0_31 = arith.constant 0 : index
      %56 = vector.load %arg7[%c0_30, %c0_31] : memref<32x32xf32, #tpu.memory_space<vmem>>, vector<32x32xf32>
      %cst_32 = arith.constant dense<0.000000e+00> : vector<8x32xf32>
      %57 = tpu.matmul %55, %56, %cst_32 {dimension_numbers = #tpu.dot_dimension_numbers<[1], [0], [0], [1], [0, 0, 1, 1], [], []>} : vector<8x32xf32>, vector<32x32xf32>, vector<8x32xf32> -> vector<8x32xf32>
      %c0_33 = arith.constant 0 : index
      %c0_34 = arith.constant 0 : index
      %58 = vector.load %arg8[%c0_33, %c0_34] : memref<1x32xf32, #tpu.memory_space<vmem>>, vector<1x32xf32>
      %c0_35 = arith.constant 0 : index
      %c0_36 = arith.constant 0 : index
      %59 = vector.load %arg9[%c0_35, %c0_36] : memref<1x32xf32, #tpu.memory_space<vmem>>, vector<1x32xf32>
      %cst_37 = arith.constant dense<0.000000e+00> : vector<32xf32>
      %60 = vector.multi_reduction <add>, %57, %cst_37 [0] : vector<8x32xf32> to vector<32xf32>
      %61 = vector.shape_cast %60 : vector<32xf32> to vector<1x32xf32>
      %cst_38 = arith.constant 8.000000e+00 : f32
      %62 = vector.broadcast %cst_38 : f32 to vector<1x32xf32>
      %63 = arith.divf %61, %62 : vector<1x32xf32>
      %64 = vector.broadcast %63 : vector<1x32xf32> to vector<8x32xf32>
      %65 = arith.subf %57, %64 : vector<8x32xf32>
      %66 = arith.mulf %65, %65 : vector<8x32xf32>
      %cst_39 = arith.constant dense<0.000000e+00> : vector<32xf32>
      %67 = vector.multi_reduction <add>, %66, %cst_39 [0] : vector<8x32xf32> to vector<32xf32>
      %68 = vector.shape_cast %67 : vector<32xf32> to vector<1x32xf32>
      %cst_40 = arith.constant 8.000000e+00 : f32
      %69 = vector.broadcast %cst_40 : f32 to vector<1x32xf32>
      %70 = arith.divf %68, %69 : vector<1x32xf32>
      %71 = vector.broadcast %63 : vector<1x32xf32> to vector<8x32xf32>
      %72 = arith.subf %57, %71 : vector<8x32xf32>
      %cst_41 = arith.constant 9.99999974E-6 : f32
      %73 = vector.broadcast %cst_41 : f32 to vector<1x32xf32>
      %74 = arith.addf %70, %73 : vector<1x32xf32>
      %75 = math.rsqrt %74 : vector<1x32xf32>
      %76 = vector.broadcast %75 : vector<1x32xf32> to vector<8x32xf32>
      %77 = arith.mulf %72, %76 : vector<8x32xf32>
      %78 = vector.broadcast %58 : vector<1x32xf32> to vector<8x32xf32>
      %79 = arith.mulf %77, %78 : vector<8x32xf32>
      %80 = vector.broadcast %59 : vector<1x32xf32> to vector<8x32xf32>
      %81 = arith.addf %79, %80 : vector<8x32xf32>
      %cst_42 = arith.constant 0.000000e+00 : f32
      %82 = vector.broadcast %cst_42 : f32 to vector<8x32xf32>
      %83 = arith.cmpf ogt, %81, %82 : vector<8x32xf32>
      %cst_43 = arith.constant 2.000000e-01 : f32
      %84 = vector.broadcast %cst_43 : f32 to vector<8x32xf32>
      %85 = arith.mulf %84, %81 : vector<8x32xf32>
      %86 = arith.select %83, %81, %85 : vector<8x32xi1>, vector<8x32xf32>
      %c0_44 = arith.constant 0 : index
      %c0_45 = arith.constant 0 : index
      %87 = vector.load %arg13[%c0_44, %c0_45] : memref<8x32xf32, #tpu.memory_space<vmem>>, vector<8x32xf32>
      tpu.vector_store %arg13[%c0_44, %c0_45], %86 {strides = array<i32>} : memref<8x32xf32, #tpu.memory_space<vmem>>, vector<8x32xf32>,
    } else {
    }
    %c8_i32 = arith.constant 8 : i32
    %3 = arith.muli %arg0, %c8_i32 : i32
    %4 = tpu.assume_multiple %3, 8 : i32
    %5 = arith.index_cast %4 : i32 to index
    %c0 = arith.constant 0 : index
    %6 = vector.load %arg13[%5, %c0] : memref<8x32xf32, #tpu.memory_space<vmem>>, vector<8x32xf32>
    %c0_1 = arith.constant 0 : index
    %c0_2 = arith.constant 0 : index
    %7 = vector.load %arg10[%c0_1, %c0_2] : memref<32x784xf32, #tpu.memory_space<vmem>>, vector<32x784xf32>
    %cst = arith.constant dense<0.000000e+00> : vector<8x784xf32>
    %8 = tpu.matmul %6, %7, %cst {dimension_numbers = #tpu.dot_dimension_numbers<[1], [0], [0], [1], [0, 0, 1, 1], [], []>} : vector<8x32xf32>, vector<32x784xf32>, vector<8x784xf32> -> vector<8x784xf32>
    %c0_3 = arith.constant 0 : index
    %c0_4 = arith.constant 0 : index
    %9 = vector.load %arg11[%c0_3, %c0_4] : memref<1x784xf32, #tpu.memory_space<vmem>>, vector<1x784xf32>
    %10 = vector.broadcast %9 : vector<1x784xf32> to vector<8x784xf32>
    %11 = arith.addf %8, %10 : vector<8x784xf32>
    %12 = math.tanh %11 : vector<8x784xf32>
    %c0_5 = arith.constant 0 : index
    %c0_6 = arith.constant 0 : index
    %13 = vector.load %arg12[%c0_5, %c0_6] : memref<8x784xf32, #tpu.memory_space<vmem>>, vector<8x784xf32>
    tpu.vector_store %arg12[%c0_5, %c0_6], %12 {strides = array<i32>} : memref<8x784xf32, #tpu.memory_space<vmem>>, vector<8x784xf32>,
    return
  }
  func.func @transform_0(%arg0: i32) -> (i32, i32) {
    %c0_i32 = arith.constant 0 : i32
    %c0_i32_0 = arith.constant 0 : i32
    %c0_i32_1 = arith.constant 0 : i32
    return %c0_i32, %c0_i32_0 : i32, i32
  }
  func.func @transform_1(%arg0: i32) -> (i32, i32) {
    %c0_i32 = arith.constant 0 : i32
    %c0_i32_0 = arith.constant 0 : i32
    %c0_i32_1 = arith.constant 0 : i32
    return %c0_i32, %c0_i32_0 : i32, i32
  }
  func.func @transform_2(%arg0: i32) -> (i32, i32) {
    %c0_i32 = arith.constant 0 : i32
    %c0_i32_0 = arith.constant 0 : i32
    %c0_i32_1 = arith.constant 0 : i32
    return %c0_i32, %c0_i32_0 : i32, i32
  }
  func.func @transform_3(%arg0: i32) -> (i32, i32) {
    %c0_i32 = arith.constant 0 : i32
    %c0_i32_0 = arith.constant 0 : i32
    %c0_i32_1 = arith.constant 0 : i32
    return %c0_i32, %c0_i32_0 : i32, i32
  }
  func.func @transform_4(%arg0: i32) -> (i32, i32) {
    %c0_i32 = arith.constant 0 : i32
    %c0_i32_0 = arith.constant 0 : i32
    %c0_i32_1 = arith.constant 0 : i32
    return %c0_i32, %c0_i32_0 : i32, i32
  }
  func.func @transform_5(%arg0: i32) -> (i32, i32) {
    %c0_i32 = arith.constant 0 : i32
    %c0_i32_0 = arith.constant 0 : i32
    %c0_i32_1 = arith.constant 0 : i32
    return %c0_i32, %c0_i32_0 : i32, i32
  }
  func.func @transform_6(%arg0: i32) -> (i32, i32) {
    %c0_i32 = arith.constant 0 : i32
    %c0_i32_0 = arith.constant 0 : i32
    %c0_i32_1 = arith.constant 0 : i32
    return %c0_i32, %c0_i32_0 : i32, i32
  }
  func.func @transform_7(%arg0: i32) -> (i32, i32) {
    %c0_i32 = arith.constant 0 : i32
    %c0_i32_0 = arith.constant 0 : i32
    %c0_i32_1 = arith.constant 0 : i32
    return %c0_i32, %c0_i32_0 : i32, i32
  }
  func.func @transform_8(%arg0: i32) -> (i32, i32) {
    %c0_i32 = arith.constant 0 : i32
    %c0_i32_0 = arith.constant 0 : i32
    %c0_i32_1 = arith.constant 0 : i32
    return %c0_i32, %c0_i32_0 : i32, i32
  }
  func.func @transform_9(%arg0: i32) -> (i32, i32) {
    %c0_i32 = arith.constant 0 : i32
    %c0_i32_0 = arith.constant 0 : i32
    %c0_i32_1 = arith.constant 0 : i32
    return %c0_i32, %c0_i32_0 : i32, i32
  }
  func.func @transform_10(%arg0: i32) -> (i32, i32) {
    %c0_i32 = arith.constant 0 : i32
    %c0_i32_0 = arith.constant 0 : i32
    %c0_i32_1 = arith.constant 0 : i32
    return %c0_i32, %c0_i32_0 : i32, i32
  }
  func.func @transform_11(%arg0: i32) -> (i32, i32) {
    %c0_i32 = arith.constant 0 : i32
    %c0_i32_0 = arith.constant 0 : i32
    return %arg0, %c0_i32 : i32, i32
  }
}

</mosaic_0001>

<bundles_post_ra>
// kernel: tpu_custom_call.1
= control target key start
LH: loop header
LB: loop body
LE: loop exit
PB: predicated region body
PF: predicated region fallthrough
CT: control target
= control target key end

     0   :  { %16 = vsyncpa [#allocation4], 0  ;;  %s1368_s0 = inlined_call_operand.vmem [shape: f32[8,2], index: 0, kind: input, shape index: {}]   ;;  %s1369_s1 = inlined_call_operand.hbm [shape: f32[2,8], index: 1, kind: input, shape index: {}]   ;;  %s1370_s2 = inlined_call_operand.hbm [shape: f32[1,8], index: 2, kind: input, shape index: {}]   ;;  %s1371_s3 = inlined_call_operand.hbm [shape: f32[8,32], index: 3, kind: input, shape index: {}]   ;;  %s1372_s4 = inlined_call_operand.hbm [shape: f32[1,32], index: 4, kind: input, shape index: {}]   ;;  %s1373_s5 = inlined_call_operand.hbm [shape: f32[1,32], index: 5, kind: input, shape index: {}]   ;;  %s1374_s6 = inlined_call_operand.vmem [shape: f32[32,32], index: 6, kind: input, shape index: {}]   ;;  %s1375_s7 = inlined_call_operand.vmem [shape: f32[1,32], index: 7, kind: input, shape index: {}]   ;;  %s1376_s8 = inlined_call_operand.hbm [shape: f32[1,32], index: 8, kind: input, shape index: {}]   ;;  %s1377_s9 = inlined_call_operand.hbm [shape: f32[32,784], index: 9, kind: input, shape index: {}]   ;;  %s1378_s10 = inlined_call_operand.vmem [shape: f32[1,784], index: 10, kind: input, shape index: {}]   ;;  %s1379_s11 = inlined_call_operand.hbm [shape: f32[8,784], index: 11, kind: output, shape index: {}]  }
   0x1   :  { %17 = vsyncpa [#allocation7], 0 }
   0x2   :  { %18 = vsyncpa [#allocation10], 0 }
   0x3   :  { %19 = vsyncpa [#allocation13], 0 }
   0x4   :  { %20 = vsyncpa [#allocation5], 0  ;;  %s1151_s17 = smov [#allocation6]   ;;  %s1152_s19 = smov [#allocation9]  }
   0x5   :  { %s39_s18 = sshll.u32 %s1151_s17, 4  ;;  %s59_s20 = sshll.u32 %s1152_s19, 4  ;;  %s40_s18 = int_to_ptr.vmem [resolvable:$true] %s39_s18  ;;  %s60_s20 = int_to_ptr.vmem [resolvable:$true] %s59_s20 }
   0x6   :  { %s965_s23 = scalar_lea.hbm %s1370_s2, 16 }
   0x7   :  { %p966_p0 = scmp.ne.s32.totalorder %s1370_s2, %s965_s23  ;;  %p969_p1 = scmp.lt.u32.totalorder %s965_s23, %s1370_s2 }
   0x9   :  { %p971_p2 = pnand %p969_p1, %p966_p0 }
   0xb   :  { %974 = shalt.err (!%p971_p2)
}
   0xc   :  { %s975_s28 = scalar_lea.vmem %s40_s18, 16  ;;  %s979_s29 = scalar_lea.vmem %s40_s18, 32 }
   0xd   :  { %p976_p3 = scmp.ne.s32.totalorder %s40_s18, %s975_s28  ;;  %p980_p4 = scmp.lt.s32.totalorder %s40_s18, %s40_s18 }
   0xe   :  { %p981_p5 = scmp.lt.s32.totalorder %s979_s29, %s975_s28 }
  0x10   :  { %p982_p6 = por %p981_p5, %p980_p4 }
  0x12   :  { %p983_p7 = pnand %p982_p6, %p976_p3 }
  0x14   :  { %986 = shalt.err (!%p983_p7)
}
  0x15   :  { %42 = dma.hbm_to_vmem [thread:$0]  %s1370_s2, 16, %s40_s18, [#allocation7]  }
  0x16   :  { %s987_s15 = scalar_lea.hbm %s1372_s4, 16 }
  0x17   :  { %p988_p8 = scmp.ne.s32.totalorder %s1372_s4, %s987_s15  ;;  %p991_p9 = scmp.lt.u32.totalorder %s987_s15, %s1372_s4 }
  0x19   :  { %p993_p10 = pnand %p991_p9, %p988_p8 }
  0x1b   :  { %996 = shalt.err (!%p993_p10)
}
  0x1c   :  { %s997_s22 = scalar_lea.vmem %s60_s20, 16  ;;  %s1001_s23 = scalar_lea.vmem %s60_s20, 32 }
  0x1d   :  { %p998_p11 = scmp.ne.s32.totalorder %s60_s20, %s997_s22  ;;  %p1002_p12 = scmp.lt.s32.totalorder %s60_s20, %s60_s20 }
  0x1e   :  { %p1003_p13 = scmp.lt.s32.totalorder %s1001_s23, %s997_s22 }
  0x20   :  { %p1004_p0 = por %p1003_p13, %p1002_p12 }
  0x22   :  { %p1005_p1 = pnand %p1004_p0, %p998_p11 }
  0x24   :  { %1008 = shalt.err (!%p1005_p1)
}
  0x25   :  { %62 = dma.hbm_to_vmem [thread:$0]  %s1372_s4, 16, %s60_s20, [#allocation10]  }
  0x26   :  { %s1153_s24 = smov [#allocation12]   ;;  %s1154_s26 = smov [#allocation3]  }
  0x27   :  { %s83_s25 = sshll.u32 %s1153_s24, 4  ;;  %s29_s27 = sshll.u32 %s1154_s26, 4  ;;  %s84_s25 = int_to_ptr.vmem [resolvable:$true] %s83_s25  ;;  %s30_s27 = int_to_ptr.vmem [resolvable:$true] %s29_s27 }
  0x28   :  { %s1009_s30 = scalar_lea.hbm %s1376_s8, 16 }
  0x29   :  { %p1010_p2 = scmp.ne.s32.totalorder %s1376_s8, %s1009_s30  ;;  %p1013_p3 = scmp.lt.u32.totalorder %s1009_s30, %s1376_s8 }
  0x2b   :  { %p1015_p4 = pnand %p1013_p3, %p1010_p2 }
  0x2d   :  { %1018 = shalt.err (!%p1015_p4)
}
  0x2e   :  { %s1019_s4 = scalar_lea.vmem %s84_s25, 16  ;;  %s1023_s20 = scalar_lea.vmem %s84_s25, 32 }
  0x2f   :  { %p1020_p5 = scmp.ne.s32.totalorder %s84_s25, %s1019_s4  ;;  %p1024_p6 = scmp.lt.s32.totalorder %s84_s25, %s84_s25 }
  0x30   :  { %p1025_p7 = scmp.lt.s32.totalorder %s1023_s20, %s1019_s4 }
  0x32   :  { %p1026_p8 = por %p1025_p7, %p1024_p6 }
  0x34   :  { %p1027_p9 = pnand %p1026_p8, %p1020_p5 }
  0x36   :  { %1030 = shalt.err (!%p1027_p9)
}
  0x37   :  { %86 = dma.hbm_to_vmem [thread:$0]  %s1376_s8, 16, %s84_s25, [#allocation13]  }
  0x38   :  { %s1031_s22 = scalar_lea.hbm %s1369_s1, 32 }
  0x39   :  { %p1032_p10 = scmp.ne.s32.totalorder %s1369_s1, %s1031_s22  ;;  %p1035_p11 = scmp.lt.u32.totalorder %s1031_s22, %s1369_s1 }
  0x3b   :  { %p1037_p12 = pnand %p1035_p11, %p1032_p10 }
  0x3d   :  { %1040 = shalt.err (!%p1037_p12)
}
  0x3e   :  { %s1041_s26 = scalar_lea.vmem %s30_s27, 32  ;;  %p1046_p0 = scmp.lt.s32.totalorder %s30_s27, %s30_s27 }
  0x3f   :  { %p1042_p13 = scmp.ne.s32.totalorder %s30_s27, %s1041_s26  ;;  %p1047_p1 = scmp.lt.s32.totalorder %s1041_s26, %s1041_s26 }
  0x41   :  { %p1048_p2 = por %p1047_p1, %p1046_p0 }
  0x43   :  { %p1049_p3 = pnand %p1048_p2, %p1042_p13 }
  0x45   :  { %1052 = shalt.err (!%p1049_p3)
}
  0x46   :  { %32 = dma.hbm_to_vmem [thread:$0]  %s1369_s1, 32, %s30_s27, [#allocation4]  }
  0x47   :  { %s1155_s28 = smov [#allocation8]   ;;  %s1156_s30 = smov [#allocation11]  }
  0x48   :  { %s49_s29 = sshll.u32 %s1155_s28, 4  ;;  %s69_s12 = sshll.u32 %s1156_s30, 4  ;;  %s50_s29 = int_to_ptr.vmem [resolvable:$true] %s49_s29  ;;  %s70_s12 = int_to_ptr.vmem [resolvable:$true] %s69_s12 }
  0x49   :  { %s1053_s15 = scalar_lea.hbm %s1371_s3, 128 }
  0x4a   :  { %p1054_p4 = scmp.ne.s32.totalorder %s1371_s3, %s1053_s15  ;;  %p1057_p5 = scmp.lt.u32.totalorder %s1053_s15, %s1371_s3 }
  0x4c   :  { %p1059_p6 = pnand %p1057_p5, %p1054_p4 }
  0x4e   :  { %1062 = shalt.err (!%p1059_p6)
}
  0x4f   :  { %s1063_s1 = scalar_lea.vmem %s50_s29, 128  ;;  %p1068_p8 = scmp.lt.s32.totalorder %s50_s29, %s50_s29 }
  0x50   :  { %p1064_p7 = scmp.ne.s32.totalorder %s50_s29, %s1063_s1  ;;  %p1069_p9 = scmp.lt.s32.totalorder %s1063_s1, %s1063_s1 }
  0x52   :  { %p1070_p10 = por %p1069_p9, %p1068_p8 }
  0x54   :  { %p1071_p11 = pnand %p1070_p10, %p1064_p7 }
  0x56   :  { %1074 = shalt.err (!%p1071_p11)
}
  0x57   :  { %52 = dma.hbm_to_vmem [thread:$0]  %s1371_s3, 128, %s50_s29, [#allocation7]  }
  0x58   :  { %s1075_s23 = scalar_lea.hbm %s1373_s5, 16 }
  0x59   :  { %p1076_p12 = scmp.ne.s32.totalorder %s1373_s5, %s1075_s23  ;;  %p1079_p13 = scmp.lt.u32.totalorder %s1075_s23, %s1373_s5 }
  0x5b   :  { %p1081_p0 = pnand %p1079_p13, %p1076_p12 }
  0x5d   :  { %1084 = shalt.err (!%p1081_p0)
}
  0x5e   :  { %s1085_s8 = scalar_lea.vmem %s70_s12, 16  ;;  %s1089_s25 = scalar_lea.vmem %s70_s12, 32 }
  0x5f   :  { %p1086_p1 = scmp.ne.s32.totalorder %s70_s12, %s1085_s8  ;;  %p1090_p2 = scmp.lt.s32.totalorder %s70_s12, %s70_s12 }
  0x60   :  { %p1091_p3 = scmp.lt.s32.totalorder %s1089_s25, %s1085_s8 }
  0x62   :  { %p1092_p4 = por %p1091_p3, %p1090_p2 }
  0x64   :  { %p1093_p5 = pnand %p1092_p4, %p1086_p1 }
  0x66   :  { %1096 = shalt.err (!%p1093_p5)
}
  0x67   :  { %72 = dma.hbm_to_vmem [thread:$0]  %s1373_s5, 16, %s70_s12, [#allocation10]  }
  0x68   :  { %s1157_s29 = smov [#allocation14]   ;;  %s1097_s15 = scalar_lea.hbm %s1377_s9, 3584 }
  0x69   :  { %s92_s30 = sshll.u32 %s1157_s29, 4  ;;  %p1098_p6 = scmp.ne.s32.totalorder %s1377_s9, %s1097_s15  ;;  %s93_s30 = int_to_ptr.vmem [resolvable:$true] %s92_s30 }
  0x6a   :  { %p1101_p7 = scmp.lt.u32.totalorder %s1097_s15, %s1377_s9 }
  0x6c   :  { %p1103_p8 = pnand %p1101_p7, %p1098_p6 }
  0x6e   :  { %1106 = shalt.err (!%p1103_p8)
}
  0x6f   :  { %s1107_s1 = scalar_lea.vmem %s93_s30, 3584  ;;  %p1112_p10 = scmp.lt.s32.totalorder %s93_s30, %s93_s30 }
  0x70   :  { %p1108_p9 = scmp.ne.s32.totalorder %s93_s30, %s1107_s1  ;;  %p1113_p11 = scmp.lt.s32.totalorder %s1107_s1, %s1107_s1 }
  0x72   :  { %p1114_p12 = por %p1113_p11, %p1112_p10 }
  0x74   :  { %p1115_p13 = pnand %p1114_p12, %p1108_p9 }
  0x76   :  { %1118 = shalt.err (!%p1115_p13)
}
  0x77   :  { %s1158_s5 = smov 896   ;;  %s1159_s12 = smov 56  }
  0x78   :  { %98 = dma.hbm_to_vmem [thread:$0]  %s1377_s9, 3584, %s93_s30, [#allocation13], %s1158_s5, %s1158_s5, %s1159_s12  }
  0x79   :  { %1141 = dma.done.wait [#allocation4], 32  }
  0x7a   :  { %1142 = vsyncadd [#allocation4], 4294967264 }
  0x7b   :  { %1143 = dma.done.wait [#allocation7], 144  }
  0x7c   :  { %1144 = vsyncadd [#allocation7], 4294967152 }
  0x7d   :  { %1145 = dma.done.wait [#allocation10], 32  }
  0x7e   :  { %1146 = vsyncadd [#allocation10], 4294967264 }
  0x7f   :  { %1147 = dma.done.wait [#allocation13], 3600  }
  0x80   :  { %1148 = vsyncadd [#allocation13], 4294963696  ;;  %v1160_v0 = vmov 0.0   ;;  %vm1161_vm0 = vmmov 0   ;;  %vm139_vm1 = vcmask 1041408   ;;  %vm135_vm2 = vcmask 15360  }
  0x81   :  { %866 = vmatprep.subr.mxu1 %v1160_v0  ;;  %868 = vmatprep.mubr.msk.f32.mxu1 %vm1161_vm0, %v1160_v0  ;;  %v127_v1 = vld [vmem:[#allocation3] sm:$0x3]  ;;  %v126_v2 = vld [vmem:[%s1368_s0] sm:$0xff]  ;;  %v839_v4 = vld [vmem:[#allocation6] ss:$0 sm:$0xff]  ;;  %vm217_vm4 = vcmask 64512  }
  0x82   :  { %884 = vmatprep.mubr.msk.f32.mxu0 %vm1161_vm0, %v1160_v0  ;;  %867 = vmatpush3.msk.msra.mxu1 %vm139_vm1, %v127_v1  ;;  %v216_v3 = vld [vmem:[#allocation8] sm:$0xff]  ;;  %v334_v11 = vld [vmem:[%s1374_s6 + $0x8] sm:$0xff]  ;;  %v1162_v13 = vmov 0.0|0.0   ;;  %v335_v14 = vld [vmem:[%s1374_s6 + $0x10] sm:$0xff]  ;;  %vm293_vm5 = vcmask 261120   ;;  %vm819_vm8 = vcmask 130048  }
  0x83   :  { %869 = vmatmul.mubr.msk.f32.vlgmr.msra.gmra.mrb[0].mxu1 %vm135_vm2, %v126_v2  ;;  %871 = vmatprep.subr.mxu1 %v1160_v0  ;;  %v333_v10 = vld [vmem:[%s1374_s6] sm:$0xff]  ;;  %v336_v15 = vld [vmem:[%s1374_s6 + $0x18] sm:$0xff]  ;;  %v462_v47 = vld [vmem:[#allocation14 + $0x40] sm:$0xff] }
  0x84   :  { %873 = vmatprep.mubr.msk.f32.mxu1 %vm1161_vm0, %v1160_v0  ;;  %872 = vmatpush3.msra.mxu1 %v216_v3  ;;  %v899_v12 = vpack.c.bf16 %v334_v11, %v333_v10  ;;  %v902_v16 = vpack.c.bf16 %v336_v15, %v335_v14  ;;  %v843_v39 = vld [vmem:[#allocation9] ss:$0 sm:$0xff]  ;;  %v844_v41 = vld [vmem:[#allocation11] ss:$0 sm:$0xff]  ;;  %v455_v46 = vld [vmem:[#allocation14 + $0x8] sm:$0xff] }
  0x85   :  { %898 = vmatprep.subr.bf16.mxu0 %v1162_v13  ;;  %v457_v48 = vld [vmem:[#allocation14 + $0x18] sm:$0xff]  ;;  %v904_v49 = vpack.c.bf16 %v462_v47, %v455_v46  ;;  %v464_v50 = vld [vmem:[#allocation14 + $0x50] sm:$0xff]  ;;  %v454_v51 = vld [vmem:[#allocation14] sm:$0xff] }
  0x86   :  { %900 = vmatpush3.bf16.msra.mxu0 %v899_v12  ;;  %v461_v52 = vld [vmem:[#allocation14 + $0x38] sm:$0xff]  ;;  %v912_v53 = vpack.c.bf16 %v464_v50, %v457_v48  ;;  %v456_v55 = vld [vmem:[#allocation14 + $0x10] sm:$0xff]  ;;  %v463_v56 = vld [vmem:[#allocation14 + $0x48] sm:$0xff] }
  0x87   :  { %901 = vmatprep.subr.bf16.mxu0 %v1162_v13  ;;  %v906_v54 = vpack.c.bf16 %v461_v52, %v454_v51  ;;  %905 = vmatprep.subr.bf16.mxu1 %v904_v49  ;;  %v914_v57 = vpack.c.bf16 %v463_v56, %v456_v55  ;;  %v469_v58 = vld [vmem:[#allocation14 + $0x78] sm:$0xff]  ;;  %v476_v59 = vld [vmem:[#allocation14 + $0xb0] sm:$0xff]  ;;  %v471_v60 = vld [vmem:[#allocation14 + $0x88] sm:$0xff]  ;;  %v484_v56 = vlaneseq }
  0x88   :  { %v908_v61 = vpack.c.bf16 %v476_v59, %v469_v58  ;;  %v478_v62 = vld [vmem:[#allocation14 + $0xc0] sm:$0xff]  ;;  %v468_v63 = vld [vmem:[#allocation14 + $0x70] sm:$0xff]  ;;  %v475_v1 = vld [vmem:[#allocation14 + $0xa8] sm:$0xff] }
  0x89   :  { %v916_v2 = vpack.c.bf16 %v478_v62, %v471_v60  ;;  %v910_v3 = vpack.c.bf16 %v475_v1, %v468_v63  ;;  %v472_v48 = vld [vmem:[#allocation14 + $0x90] sm:$0xff]  ;;  %v479_v50 = vld [vmem:[#allocation14 + $0xc8] sm:$0xff]  ;;  %v474_v51 = vld [vmem:[#allocation14 + $0xa0] sm:$0xff] }
  0x8a   :  { %903 = vmatpush3.bf16.msra.mxu0 %v902_v16  ;;  %v481_v52 = vld [vmem:[#allocation14 + $0xd8] sm:$0xff] }
  0x8b   :  { %913 = vmatprep.subr.bf16.mxu0 %v912_v53  ;;  %v932_v55 = vpack.c.bf16 %v481_v52, %v474_v51  ;;  %v482_v60 = vld [vmem:[%s1378_s10] sm:$0x7f]  ;;  %s1163_s10 = smov [#allocation15]  }
  0x8c   :  { %s827_s28 = sshll.u32 %s1163_s10, 4  ;;  %s828_s28 = int_to_ptr.vmem [resolvable:$true] %s827_s28 }
  0x8d   :  { %s1119_s29 = scalar_lea.vmem %s828_s28, 896  ;;  %p1124_p1 = scmp.lt.s32.totalorder %s828_s28, %s828_s28 }
  0x8e   :  { %p1120_p0 = scmp.ne.s32.totalorder %s828_s28, %s1119_s29  ;;  %p1125_p2 = scmp.lt.s32.totalorder %s1119_s29, %s1119_s29 }
  0x90   :  { %p1126_p3 = por %p1125_p2, %p1124_p1 }
  0x92   :  { %p1127_p4 = pnand %p1126_p3, %p1120_p0 }
 0x156   :  { %v209_v5 = vpop.f32.mrb[0].mxu1 }
 0x157   :  { %v210_v6 = vadd.f32 %v839_v4, %v209_v5  ;;  %v870_v7 = vpop.f32.mrb[1].mxu1  ;;  %v470_v4 = vld [vmem:[#allocation14 + $0x80] sm:$0xff]  ;;  %v477_v5 = vld [vmem:[#allocation14 + $0xb8] sm:$0xff] }
 0x158   :  { %v918_v7 = vpack.c.bf16 %v477_v5, %v470_v4 }
 0x159   :  { %vm213_vm3 = vcmp.gt.f32.partialorder %v210_v6, 0.0  ;;  %v214_v8 = vmul.f32 0.2, %v210_v6 }
 0x15b   :  { %v215_v9 = vsel %vm213_vm3, %v210_v6, %v214_v8  ;;  %v459_v6 = vld [vmem:[#allocation14 + $0x28] sm:$0xff]  ;;  %v466_v8 = vld [vmem:[#allocation14 + $0x60] sm:$0xff] }
 0x15c   :  { %874 = vmatmul.mubr.msk.f32.vlgmr.msra.gmra.mrb[2].mxu1 %vm217_vm4, %v215_v9  ;;  %v920_v9 = vpack.c.bf16 %v466_v8, %v459_v6 }
 0x15d   :  { %587 = vmatprep.mubr.f32.mxu1 %v1160_v0  ;;  %907 = vmatpush1.bf16.msra.mxu1 %v906_v54  ;;  %v926_v54 = vpack.c.bf16 %v479_v50, %v472_v48 }
 0x15e   :  { %909 = vmatprep.subr.bf16.mxu1 %v908_v61 }
 0x161   :  { %911 = vmatpush1.bf16.msra.mxu1 %v910_v3 }
 0x162   :  { %921 = vmatprep.subr.bf16.mxu1 %v920_v9 }
 0x22f   :  { %v287_v17 = vpop.f32.mrb[2].mxu1 }
 0x230   :  { %v294_v18 = vsel %vm293_vm5, %v287_v17, 0.0  ;;  %v875_v19 = vpop.f32.mrb[3].mxu1 }
 0x231   :  { %v295_v20 = vrot.slane %v294_v18, 4 }
 0x233   :  { %v296_v21 = vadd.f32 %v295_v20, %v294_v18 }
 0x235   :  { %v297_v22 = vrot.slane %v296_v21, 2 }
 0x237   :  { %v298_v23 = vadd.f32 %v297_v22, %v296_v21 }
 0x239   :  { %v299_v24 = vrot.slane %v298_v23, 1 }
 0x23b   :  { %v300_v25 = vadd.f32 %v299_v24, %v298_v23 }
 0x23d   :  { %v302_v26 = vmul.f32 0.125, %v300_v25 }
 0x23f   :  { %v303_v27 = vsub.f32 %v287_v17, %v302_v26 }
 0x241   :  { %v304_v28 = vmul.f32 %v303_v27, %v303_v27 }
 0x243   :  { %v305_v29 = vsel %vm293_vm5, %v304_v28, 0.0 }
 0x244   :  { %v306_v30 = vrot.slane %v305_v29, 4 }
 0x246   :  { %v307_v31 = vadd.f32 %v306_v30, %v305_v29 }
 0x248   :  { %v308_v32 = vrot.slane %v307_v31, 2 }
 0x24a   :  { %v309_v33 = vadd.f32 %v308_v32, %v307_v31 }
 0x24c   :  { %v310_v34 = vrot.slane %v309_v33, 1 }
 0x24e   :  { %v311_v35 = vadd.f32 %v310_v34, %v309_v33  ;;  %v846_v33 = vld [vmem:[%s1375_s7] ss:$0 sm:$0xff] }
 0x250   :  { %v312_v36 = vmul.f32 0.125, %v311_v35  ;;  %v847_v35 = vld [vmem:[#allocation12] ss:$0 sm:$0xff] }
 0x252   :  { %v313_v37 = vadd.f32 1e-05, %v312_v36 }
 0x254   :  { %947 = vrsqrt.f32 %v313_v37 }
 0x25e   :  { %v948_v38 = vpop.eup %947 }
 0x25f   :  { %v315_v40 = vmul.f32 %v948_v38, %v303_v27 }
 0x261   :  { %v322_v42 = vmul.f32 %v843_v39, %v315_v40  ;;  %v458_v40 = vld [vmem:[#allocation14 + $0x20] sm:$0xff] }
 0x263   :  { %v329_v43 = vadd.f32 %v844_v41, %v322_v42  ;;  %v465_v41 = vld [vmem:[#allocation14 + $0x58] sm:$0xff]  ;;  %v460_v42 = vld [vmem:[#allocation14 + $0x30] sm:$0xff] }
 0x264   :  { %v922_v46 = vpack.c.bf16 %v465_v41, %v458_v40 }
 0x265   :  { %vm330_vm6 = vcmp.gt.f32.partialorder %v329_v43, 0.0  ;;  %v331_v44 = vmul.f32 0.2, %v329_v43 }
 0x267   :  { %v332_v45 = vsel %vm330_vm6, %v329_v43, %v331_v44  ;;  %v467_v43 = vld [vmem:[#allocation14 + $0x68] sm:$0xff]  ;;  %v473_v44 = vld [vmem:[#allocation14 + $0x98] sm:$0xff] }
 0x268   :  { %885 = vmatmul.mubr.msk.f32.vlgmr.msra.gmra.mrb[0].mxu0 %vm293_vm5, %v332_v45  ;;  %v480_v45 = vld [vmem:[#allocation14 + $0xd0] sm:$0xff]  ;;  %v929_v47 = vpack.c.bf16 %v467_v43, %v460_v42 }
 0x269   :  { %658 = vmatprep.mubr.f32.mxu0 %v1160_v0  ;;  %915 = vmatpush1.bf16.msra.mxu0 %v914_v57  ;;  %v924_v49 = vpack.c.bf16 %v480_v45, %v473_v44  ;;  %v485_v57 = vshrl.u32 %v484_v56, 7 }
 0x26a   :  { %917 = vmatprep.subr.bf16.mxu0 %v916_v2 }
 0x26b   :  { %v486_v58 = vsub.s32 0, %v485_v57  ;;  %v494_v59 = vsub.s32 2, %v485_v57  ;;  %v498_v61 = vsub.s32 3, %v485_v57  ;;  %v502_v8 = vsub.s32 4, %v485_v57 }
 0x26c   :  { %v510_v9 = vsub.s32 6, %v485_v57 }
 0x26d   :  { %919 = vmatpush1.bf16.msra.mxu0 %v918_v7  ;;  %v487_v62 = vrot.slane %v482_v60, %v486_v58  ;;  %v495_v63 = vrot.slane %v482_v60, %v494_v59 }
 0x26e   :  { %928 = vmatprep.subr.bf16.mxu0 %v1162_v13 }
 0x33b   :  { %v406_v10 = vpop.f32.mrb[0].mxu0 }
 0x33c   :  { %v412_v11 = vsel %vm293_vm5, %v406_v10, 0.0  ;;  %v886_v12 = vpop.f32.mrb[1].mxu0 }
 0x33d   :  { %v413_v14 = vrot.slane %v412_v11, 4  ;;  %v506_v12 = vsub.s32 5, %v485_v57 }
 0x33f   :  { %v414_v15 = vadd.f32 %v413_v14, %v412_v11  ;;  %v503_v14 = vrot.slane %v482_v60, %v502_v8 }
 0x341   :  { %v415_v16 = vrot.slane %v414_v15, 2 }
 0x343   :  { %v416_v17 = vadd.f32 %v415_v16, %v414_v15  ;;  %v511_v15 = vrot.slane %v482_v60, %v510_v9  ;;  %v507_v16 = vrot.slane %v482_v60, %v506_v12 }
 0x345   :  { %v417_v18 = vrot.slane %v416_v17, 1 }
 0x347   :  { %v418_v19 = vadd.f32 %v417_v18, %v416_v17 }
 0x349   :  { %v419_v20 = vmul.f32 0.125, %v418_v19 }
 0x34b   :  { %v420_v21 = vsub.f32 %v406_v10, %v419_v20 }
 0x34d   :  { %v421_v22 = vmul.f32 %v420_v21, %v420_v21 }
 0x34f   :  { %v422_v23 = vsel %vm293_vm5, %v421_v22, 0.0 }
 0x350   :  { %v423_v24 = vrot.slane %v422_v23, 4 }
 0x352   :  { %v424_v25 = vadd.f32 %v423_v24, %v422_v23 }
 0x354   :  { %v425_v26 = vrot.slane %v424_v25, 2 }
 0x356   :  { %v426_v27 = vadd.f32 %v425_v26, %v424_v25 }
 0x358   :  { %v427_v28 = vrot.slane %v426_v27, 1 }
 0x35a   :  { %v428_v29 = vadd.f32 %v427_v28, %v426_v27 }
 0x35c   :  { %v429_v30 = vmul.f32 0.125, %v428_v29 }
 0x35e   :  { %v430_v31 = vadd.f32 1e-05, %v429_v30 }
 0x360   :  { %949 = vrsqrt.f32 %v430_v31 }
 0x36a   :  { %v950_v32 = vpop.eup %949 }
 0x36b   :  { %v432_v34 = vmul.f32 %v950_v32, %v420_v21 }
 0x36d   :  { %v439_v36 = vmul.f32 %v846_v33, %v432_v34 }
 0x36f   :  { %v446_v37 = vadd.f32 %v847_v35, %v439_v36 }
 0x371   :  { %vm447_vm7 = vcmp.gt.f32.partialorder %v446_v37, 0.0  ;;  %v448_v38 = vmul.f32 0.2, %v446_v37 }
 0x373   :  { %v449_v39 = vsel %vm447_vm7, %v446_v37, %v448_v38 }
 0x374   :  { %450 = vst.msk [vmem:[#allocation2] sm:$0xff] %vm293_vm5, %v449_v39 }
 0x37b   :  { %v453_v53 = vld [vmem:[#allocation2] sm:$0xff] }
 0x37c   :  { %848 = vmatmul.mubr.msk.f32.vlgmr.msra.gmra.mrb[4].mxu1 %vm293_vm5, %v453_v53  ;;  %849 = vmatmul.mubr.msk.f32.vlgmr.msra.gmra.mrb[2].mxu0 %vm293_vm5, %v453_v53 }
 0x37d   :  { %923 = vmatpush1.bf16.msra.mxu1 %v922_v46  ;;  %930 = vmatpush3.bf16.msra.mxu0 %v929_v47 }
 0x37e   :  { %925 = vmatprep.subr.bf16.mxu1 %v924_v49  ;;  %931 = vmatprep.subr.bf16.mxu0 %v1162_v13  ;;  %v490_v13 = vsub.s32 1, %v485_v57 }
 0x37f   :  { %729 = vmatprep.mubr.f32.mxu1 %v1160_v0  ;;  %895 = vmatprep.mubr.msk.f32.mxu0 %vm1161_vm0, %v1160_v0  ;;  %v499_v0 = vrot.slane %v482_v60, %v498_v61 }
 0x380   :  { %v491_v1 = vrot.slane %v482_v60, %v490_v13 }
 0x381   :  { %927 = vmatpush1.bf16.msra.mxu1 %v926_v54  ;;  %933 = vmatpush3.bf16.msra.mxu0 %v932_v55 }
 0x384   :  { %850 = vmatmul.mubr.msk.f32.vlgmr.msra.gmra.mrb[6].mxu1 %vm293_vm5, %v453_v53  ;;  %896 = vmatmul.mubr.msk.f32.vlgmr.msra.gmra.mrb[4].mxu0 %vm293_vm5, %v453_v53 }
 0x44f   :  { %v589_v2 = vpop.f32.mrb[4].mxu1  ;;  %v660_v3 = vpop.f32.mrb[2].mxu0 }
 0x450   :  { %v590_v4 = vadd.f32 %v589_v2, %v487_v62  ;;  %v661_v5 = vadd.f32 %v660_v3, %v495_v63  ;;  %v591_v6 = vpop.f32.mrb[5].mxu1  ;;  %v662_v7 = vpop.f32.mrb[3].mxu0 }
 0x451   :  { %v592_v10 = vadd.f32 %v591_v6, %v491_v1  ;;  %v663_v11 = vadd.f32 %v662_v7, %v499_v0 }
 0x452   :  { %951 = vtanh.f32 %v590_v4 }
 0x453   :  { %953 = vtanh.f32 %v661_v5 }
 0x454   :  { %955 = vtanh.f32 %v592_v10 }
 0x455   :  { %957 = vtanh.f32 %v663_v11 }
 0x457   :  { %v731_v17 = vpop.f32.mrb[6].mxu1  ;;  %v802_v18 = vpop.f32.mrb[4].mxu0 }
 0x458   :  { %v732_v19 = vadd.f32 %v731_v17, %v503_v14  ;;  %v803_v20 = vadd.f32 %v802_v18, %v511_v15  ;;  %v733_v21 = vpop.f32.mrb[7].mxu1  ;;  %v897_v22 = vpop.f32.mrb[5].mxu0 }
 0x459   :  { %v734_v23 = vadd.f32 %v733_v21, %v507_v16 }
 0x45a   :  { %959 = vtanh.f32 %v732_v19 }
 0x45b   :  { %961 = vtanh.f32 %v803_v20 }
 0x45c   :  { %v952_v24 = vpop.eup %951  ;;  %963 = vtanh.f32 %v734_v23 }
 0x45d   :  { %v954_v25 = vpop.eup %953  ;;  %813 = vst [vmem:[#allocation15] sm:$0xff] %v952_v24 }
 0x45e   :  { %v956_v26 = vpop.eup %955  ;;  %815 = vst [vmem:[#allocation15 + $0x10] sm:$0xff] %v954_v25 }
 0x45f   :  { %v958_v27 = vpop.eup %957  ;;  %814 = vst [vmem:[#allocation15 + $0x8] sm:$0xff] %v956_v26 }
 0x460   :  { %816 = vst [vmem:[#allocation15 + $0x18] sm:$0xff] %v958_v27 }
 0x464   :  { %v960_v28 = vpop.eup %959 }
 0x465   :  { %v962_v29 = vpop.eup %961  ;;  %817 = vst [vmem:[#allocation15 + $0x20] sm:$0xff] %v960_v28 }
 0x466   :  { %v964_v30 = vpop.eup %963  ;;  %820 = vst.msk [vmem:[#allocation15 + $0x30] sm:$0xff] %vm819_vm8, %v962_v29 }
 0x467   :  { %818 = vst [vmem:[#allocation15 + $0x28] sm:$0xff] %v964_v30 }
 0x468   :  { %1130 = shalt.err (!%p1127_p4)
}
 0x469   :  { %s1131_s14 = scalar_lea.hbm %s1379_s11, 896 }
 0x46a   :  { %p1132_p5 = scmp.ne.s32.totalorder %s1379_s11, %s1131_s14  ;;  %p1135_p6 = scmp.lt.u32.totalorder %s1131_s14, %s1379_s11 }
 0x46c   :  { %p1137_p7 = pnand %p1135_p6, %p1132_p5 }
 0x46e   :  { %1140 = shalt.err (!%p1137_p7)
}
 0x46f   :  { %830 = dma.vmem_to_hbm [thread:$0]  %s828_s28, 896, %s1379_s11, [#allocation5]  }
 0x470   :  { %1149 = dma.done.wait [#allocation5], 896  }
 0x471   :  { %1150 = vsyncadd [#allocation5], 4294966400 }
 0x472   :  { %834 = vsyncpa [#allocation4], 1 }
 0x473   :  { %835 = vsyncpa [#allocation7], 1 }
 0x474   :  { %836 = vsyncpa [#allocation10], 1 }
 0x475   :  { %837 = vsyncpa [#allocation13], 1 }
 0x476   :  { %838 = vsyncpa [#allocation5], 1 }

</bundles_post_ra>
